<compile_context>
chip_gen: v7x
topology: tpu7x:2x2x1
jax: 0.10.0
libtpu: 0.0.40
codegen_flags: <defaults>
</compile_context>

<pallas_src>
import functools

import numpy as np

import jax
import jax.numpy as jnp
from jax.experimental import pallas as pl
from jax.experimental.pallas import tpu as pltpu


def _round_up(x, m):
    return ((x + m - 1) // m) * m


# ---------------------------------------------------------------------------
# Kernels.  Grid = (Mp//tm, Np//tn, Kp//tk); the reduction axis (k) is last.
# "noacc" variants accumulate straight into the f32 output block (it stays
# resident in VMEM across k since the out index_map ignores k); "acc" variants
# use an f32 VMEM scratch and cast only on the final store (non-f32 outputs).
# ---------------------------------------------------------------------------


def _linear_bias_noacc_kernel(x_ref, w_ref, b_ref, o_ref):
    k = pl.program_id(2)

    @pl.when(k == 0)
    def _():
        o_ref[...] = jnp.zeros_like(o_ref)

    o_ref[...] += jnp.dot(x_ref[...], w_ref[...],
                          preferred_element_type=jnp.float32)

    @pl.when(k == pl.num_programs(2) - 1)
    def _():
        # Bias added exactly once, in f32, in the epilogue.
        o_ref[...] += b_ref[...].astype(jnp.float32)


def _linear_nobias_noacc_kernel(x_ref, w_ref, o_ref):
    k = pl.program_id(2)

    @pl.when(k == 0)
    def _():
        o_ref[...] = jnp.zeros_like(o_ref)

    o_ref[...] += jnp.dot(x_ref[...], w_ref[...],
                          preferred_element_type=jnp.float32)


def _linear_bias_acc_kernel(x_ref, w_ref, b_ref, o_ref, acc_ref):
    k = pl.program_id(2)

    @pl.when(k == 0)
    def _():
        acc_ref[...] = jnp.zeros_like(acc_ref)

    acc_ref[...] += jnp.dot(x_ref[...], w_ref[...],
                            preferred_element_type=jnp.float32)

    @pl.when(k == pl.num_programs(2) - 1)
    def _():
        # Epilogue math stays in f32; cast only on the final store.
        o_ref[...] = (acc_ref[...] + b_ref[...].astype(jnp.float32)).astype(
            o_ref.dtype)


def _linear_nobias_acc_kernel(x_ref, w_ref, o_ref, acc_ref):
    k = pl.program_id(2)

    @pl.when(k == 0)
    def _():
        acc_ref[...] = jnp.zeros_like(acc_ref)

    acc_ref[...] += jnp.dot(x_ref[...], w_ref[...],
                            preferred_element_type=jnp.float32)

    @pl.when(k == pl.num_programs(2) - 1)
    def _():
        o_ref[...] = acc_ref[...].astype(o_ref.dtype)


def _pick_vmem_limit_bytes():
    """Per-generation VMEM budget: ~75% of physical capacity, capped at 96 MiB.

    -> ~48 MiB on v7x (64 MiB physical), 96 MiB on v5e/v6e (128 MiB physical).
    Falls back to the conservative v7x figure if the query is unavailable.
    """
    cap = None
    try:
        info = pltpu.get_tpu_info()
        cap = getattr(info, "vmem_capacity_bytes", None)
    except Exception:
        cap = None
    if not cap:
        cap = 64 * 1024 * 1024
    return int(min(96 * 1024 * 1024, (cap * 3) // 4))


@functools.partial(
    jax.jit,
    static_argnames=("out_dtype", "compute_dtype", "n_out", "tm", "tn", "tk"))
def _linear_pallas_impl(x, w_p, b_p, *, out_dtype, compute_dtype, n_out,
                        tm, tn, tk):
    """x: (M, K) raw; w_p: (Kp, Np) pre-padded/cast; b_p: (1, Np) f32 or None."""
    M, K = x.shape
    Kp, Np = w_p.shape

    # --- tile selection ------------------------------------------------------
    # tn/tk were fixed when the weight was padded; clamp tm per call.  Round to
    # 256 so the 2x256x256 MXUs on v6e/v7x see full tiles (128-multiples already
    # suffice on v5e's 4x128x128 MXU, 256 costs nothing there).
    tm = min(tm, _round_up(M, 256))
    Mp = _round_up(M, tm)

    # Keep the parallel grid non-degenerate so both v7x TensorCores get work.
    if (Mp // tm) * (Np // tn) == 1 and tn >= 512 and tn % 512 == 0:
        tn = tn // 2  # Np stays divisible; tn//2 is still a 256-multiple.

    grid = (Mp // tm, Np // tn, Kp // tk)

    # --- pad + cast the activation (weight/bias were preprocessed at init) ---
    x_c = x.astype(compute_dtype)
    if Mp != M or Kp != K:
        # Zero rows/cols contribute nothing to the K-reduction; padded output
        # rows/cols are sliced off below.
        x_c = jnp.pad(x_c, ((0, Mp - M), (0, Kp - K)))

    use_acc = np.dtype(out_dtype) != np.dtype(np.float32)

    in_specs = [
        pl.BlockSpec((tm, tk), lambda i, j, k: (i, k)),  # x tile
        pl.BlockSpec((tk, tn), lambda i, j, k: (k, j)),  # W tile
        # TODO(synk): add pipeline_mode=pl.Buffered(3) to the W spec if a
        # profile still shows exposed weight DMA on the f32-compute path.
    ]
    args = [x_c, w_p]

    if b_p is not None:
        in_specs.append(pl.BlockSpec((1, tn), lambda i, j, k: (0, j)))
        args.append(b_p)
        kernel = _linear_bias_acc_kernel if use_acc else _linear_bias_noacc_kernel
    else:
        kernel = _linear_nobias_acc_kernel if use_acc else _linear_nobias_noacc_kernel

    # f32 outputs accumulate directly into the resident output block; the
    # scratch accumulator is only needed for low-precision outputs.
    scratch_shapes = [pltpu.VMEM((tm, tn), jnp.float32)] if use_acc else []

    c_item = np.dtype(compute_dtype).itemsize
    o_item = np.dtype(out_dtype).itemsize
    cost = pl.CostEstimate(
        flops=2 * Mp * Np * Kp,
        transcendentals=0,
        bytes_accessed=(c_item * (Mp * Kp + Kp * Np)
                        + o_item * Mp * Np
                        + (4 * Np if b_p is not None else 0)),
    )

    out = pl.pallas_call(
        kernel,
        out_shape=jax.ShapeDtypeStruct((Mp, Np), out_dtype),
        grid_spec=pltpu.PrefetchScalarGridSpec(
            num_scalar_prefetch=0,
            grid=grid,
            in_specs=in_specs,
            out_specs=pl.BlockSpec((tm, tn), lambda i, j, k: (i, j)),
            scratch_shapes=scratch_shapes,
        ),
        compiler_params=pltpu.CompilerParams(
            # M/N parallel (v7x megacore shard), K reduction kept last.
            dimension_semantics=("parallel", "parallel", "arbitrary"),
            vmem_limit_bytes=_pick_vmem_limit_bytes(),
        ),
        cost_estimate=cost,
    )(*args)

    if Mp != M or Np != n_out:
        out = out[:M, :n_out]
    return out


class PallasLinear:
    """Pallas-TPU equivalent of the reference `Linear` module: y = x @ W + b.

    weight: (in_features, out_features); bias: (out_features,) or None.
    The weight (and bias) are padded to full tiles and cast to the compute
    dtype ONCE here, so the per-call hot path only pads/casts the activation.

    compute_dtype=jnp.bfloat16 enables the bf16 MXU path (f32 accumulation,
    output dtype unchanged) for ~3-4x throughput when the model tolerates it.
    """

    def __init__(self, weight, bias=None, *, compute_dtype=None,
                 tm=512, tn=1024, tk=512):
        K, N = weight.shape
        self.in_features = K
        self.out_features = N
        self.compute_dtype = (np.dtype(compute_dtype) if compute_dtype is not None
                              else np.dtype(weight.dtype))
        # N/K tiles depend only on the weight shape -> finalize now, rounded to
        # 256 for the v6e/v7x MXU width.
        self.tn = min(tn, _round_up(N, 256))
        self.tk = min(tk, _round_up(K, 256))
        self.tm = tm
        Np = _round_up(N, self.tn)
        Kp = _round_up(K, self.tk)

        w = weight.astype(self.compute_dtype)
        if Np != N or Kp != K:
            w = jnp.pad(w, ((0, Kp - K), (0, Np - N)))
        self.w_p = w

        if bias is not None:
            b = bias.astype(jnp.float32)  # epilogue math stays in f32
            if Np != N:
                b = jnp.pad(b, (0, Np - N))
            self.b_p = b.reshape(1, Np)
        else:
            self.b_p = None

    def __call__(self, x):
        return _linear_pallas_impl(
            x, self.w_p, self.b_p,
            out_dtype=np.dtype(x.dtype),
            compute_dtype=self.compute_dtype,
            n_out=self.out_features,
            tm=self.tm, tn=self.tn, tk=self.tk)


def linear_pallas(x, weight, bias=None, *, compute_dtype=None,
                  tm=512, tn=1024, tk=512):
    """One-shot functional API.  For repeated calls prefer `PallasLinear`,
    which hoists the constant weight padding/cast out of the hot path."""
    return PallasLinear(weight, bias, compute_dtype=compute_dtype,
                        tm=tm, tn=tn, tk=tk)(x)


if __name__ == "__main__":
    # Small deterministic shapes consistent with the module
    # (module __init__ draws weight/bias from uniform(-0.1, 0.1)).
    input_features = 32
    output_features = 32
    batch = 8

    key = jax.random.PRNGKey(0)
    kx, kw, kb = jax.random.split(key, 3)

    x = jax.random.normal(kx, (batch, input_features), dtype=jnp.float32)
    weight = jax.random.uniform(
        kw, (input_features, output_features), dtype=jnp.float32,
        minval=-0.1, maxval=0.1)
    bias = jax.random.uniform(
        kb, (output_features,), dtype=jnp.float32, minval=-0.1, maxval=0.1)

    y_ref = x @ weight + bias

    # 1) f32 compute (exact semantics of the reference module), bias path.
    lin_f32 = PallasLinear(weight, bias)
    y = jax.block_until_ready(lin_f32(x))
    assert y.shape == (batch, output_features)
    assert jnp.allclose(y, y_ref, atol=1e-5, rtol=1e-5), "f32 bias path mismatch"

    # 2) f32 compute, no-bias path (specialized kernel, no dummy bias DMA).
    lin_nb = PallasLinear(weight, None)
    y_nb = jax.block_until_ready(lin_nb(x))
    assert jnp.allclose(y_nb, x @ weight, atol=1e-5, rtol=1e-5), \
        "no-bias path mismatch"

    # 3) bf16 compute, f32 accumulation + f32 output (the big MXU lever).
    lin_bf16 = PallasLinear(weight, bias, compute_dtype=jnp.bfloat16)
    y_bf = jax.block_until_ready(lin_bf16(x))
    assert y_bf.dtype == jnp.float32
    assert jnp.allclose(y_bf, y_ref, atol=2e-2, rtol=2e-2), \
        "bf16-compute path mismatch"

    # 4) bf16 output (exercises the f32 scratch accumulator + cast-on-store).
    y_lo = jax.block_until_ready(lin_f32(x.astype(jnp.bfloat16)))
    assert y_lo.dtype == jnp.bfloat16
    assert jnp.allclose(y_lo.astype(jnp.float32), y_ref, atol=2e-2, rtol=2e-2), \
        "bf16-output path mismatch"

    # Functional one-shot API still works.
    y_fn = jax.block_until_ready(linear_pallas(x, weight, bias))
    assert jnp.allclose(y_fn, y_ref, atol=1e-5, rtol=1e-5), "functional mismatch"

    print("KERNEL_OK")
</pallas_src>

<mosaic_0001>
module attributes {stable_mosaic.version = 11 : i64} {
  func.func @_linear_bias_noacc_kernel(%arg0: i32, %arg1: i32, %arg2: i32, %arg3: memref<256x256xf32, #tpu.memory_space<vmem>>, %arg4: memref<256x256xf32, #tpu.memory_space<vmem>>, %arg5: memref<1x256xf32, #tpu.memory_space<vmem>>, %arg6: memref<256x256xf32, #tpu.memory_space<vmem>>) attributes {dimension_semantics = [#tpu.dimension_semantics<parallel>, #tpu.dimension_semantics<parallel>, #tpu.dimension_semantics<arbitrary>], iteration_bounds = array<i64: 1, 1, 1>, scalar_prefetch = 0 : i64, scratch_operands = 0 : i64, tpu.core_type = #tpu.core_type<tc>, window_params = [{transform_indices = @transform_0, window_bounds = array<i64: 256, 256>}, {transform_indices = @transform_1, window_bounds = array<i64: 256, 256>}, {transform_indices = @transform_2, window_bounds = array<i64: 1, 256>}, {transform_indices = @transform_3, window_bounds = array<i64: 256, 256>}]} {
    %c0_i32 = arith.constant 0 : i32
    %0 = arith.cmpi eq, %arg2, %c0_i32 : i32
    %1 = arith.extui %0 : i1 to i32
    %c0_i32_0 = arith.constant 0 : i32
    %2 = arith.cmpi ne, %1, %c0_i32_0 : i32
    scf.if %2 {
      %cst_10 = arith.constant 0.000000e+00 : f32
      %12 = vector.broadcast %cst_10 : f32 to vector<256x256xf32>
      %c0_11 = arith.constant 0 : index
      %c0_12 = arith.constant 0 : index
      %13 = vector.load %arg6[%c0_11, %c0_12] : memref<256x256xf32, #tpu.memory_space<vmem>>, vector<256x256xf32>
      tpu.vector_store %arg6[%c0_11, %c0_12], %12 {strides = array<i32>} : memref<256x256xf32, #tpu.memory_space<vmem>>, vector<256x256xf32>,
    } else {
    }
    %c0 = arith.constant 0 : index
    %c0_1 = arith.constant 0 : index
    %3 = vector.load %arg6[%c0, %c0_1] : memref<256x256xf32, #tpu.memory_space<vmem>>, vector<256x256xf32>
    %c0_2 = arith.constant 0 : index
    %c0_3 = arith.constant 0 : index
    %4 = vector.load %arg3[%c0_2, %c0_3] : memref<256x256xf32, #tpu.memory_space<vmem>>, vector<256x256xf32>
    %c0_4 = arith.constant 0 : index
    %c0_5 = arith.constant 0 : index
    %5 = vector.load %arg4[%c0_4, %c0_5] : memref<256x256xf32, #tpu.memory_space<vmem>>, vector<256x256xf32>
    %cst = arith.constant dense<0.000000e+00> : vector<256x256xf32>
    %6 = tpu.matmul %4, %5, %cst {dimension_numbers = #tpu.dot_dimension_numbers<[1], [0], [0], [1], [0, 0, 1, 1], [], []>} : vector<256x256xf32>, vector<256x256xf32>, vector<256x256xf32> -> vector<256x256xf32>
    %7 = arith.addf %3, %6 : vector<256x256xf32>
    %c0_6 = arith.constant 0 : index
    %c0_7 = arith.constant 0 : index
    %8 = vector.load %arg6[%c0_6, %c0_7] : memref<256x256xf32, #tpu.memory_space<vmem>>, vector<256x256xf32>
    tpu.vector_store %arg6[%c0_6, %c0_7], %7 {strides = array<i32>} : memref<256x256xf32, #tpu.memory_space<vmem>>, vector<256x256xf32>,
    %c0_i32_8 = arith.constant 0 : i32
    %9 = arith.cmpi eq, %arg2, %c0_i32_8 : i32
    %10 = arith.extui %9 : i1 to i32
    %c0_i32_9 = arith.constant 0 : i32
    %11 = arith.cmpi ne, %10, %c0_i32_9 : i32
    scf.if %11 {
      %c0_10 = arith.constant 0 : index
      %c0_11 = arith.constant 0 : index
      %12 = vector.load %arg6[%c0_10, %c0_11] : memref<256x256xf32, #tpu.memory_space<vmem>>, vector<256x256xf32>
      %c0_12 = arith.constant 0 : index
      %c0_13 = arith.constant 0 : index
      %13 = vector.load %arg5[%c0_12, %c0_13] : memref<1x256xf32, #tpu.memory_space<vmem>>, vector<1x256xf32>
      %14 = vector.broadcast %13 : vector<1x256xf32> to vector<256x256xf32>
      %15 = arith.addf %12, %14 : vector<256x256xf32>
      %c0_14 = arith.constant 0 : index
      %c0_15 = arith.constant 0 : index
      %16 = vector.load %arg6[%c0_14, %c0_15] : memref<256x256xf32, #tpu.memory_space<vmem>>, vector<256x256xf32>
      tpu.vector_store %arg6[%c0_14, %c0_15], %15 {strides = array<i32>} : memref<256x256xf32, #tpu.memory_space<vmem>>, vector<256x256xf32>,
    } else {
    }
    return
  }
  func.func @transform_0(%arg0: i32, %arg1: i32, %arg2: i32) -> (i32, i32) {
    %c0_i32 = arith.constant 0 : i32
    return %arg0, %arg2 : i32, i32
  }
  func.func @transform_1(%arg0: i32, %arg1: i32, %arg2: i32) -> (i32, i32) {
    %c0_i32 = arith.constant 0 : i32
    return %arg2, %arg1 : i32, i32
  }
  func.func @transform_2(%arg0: i32, %arg1: i32, %arg2: i32) -> (i32, i32) {
    %c0_i32 = arith.constant 0 : i32
    %c0_i32_0 = arith.constant 0 : i32
    return %c0_i32, %arg1 : i32, i32
  }
  func.func @transform_3(%arg0: i32, %arg1: i32, %arg2: i32) -> (i32, i32) {
    %c0_i32 = arith.constant 0 : i32
    return %arg0, %arg1 : i32, i32
  }
}

</mosaic_0001>

<bundles_post_ra>
// kernel: _linear_pallas_impl.1
= control target key start
LH: loop header
LB: loop body
LE: loop exit
PB: predicated region body
PF: predicated region fallthrough
CT: control target
= control target key end

     0   :  { %s1634_s1 = inlined_call_operand.vmem [shape: f32[256,256], index: 1, kind: input, shape index: {}]   ;;  %s1635_s0 = inlined_call_operand.vmem [shape: f32[256,256], index: 0, kind: input, shape index: {}]   ;;  %s1636_s2 = inlined_call_operand.vmem [shape: f32[1,256], index: 2, kind: input, shape index: {}]   ;;  %s1637_s3 = inlined_call_operand.vmem [shape: f32[256,256], index: 3, kind: output, shape index: {}]  }
   0x1   :  { %v211_v0 = vld [vmem:[%s1634_s1 + $0x8] sm:$0xff]  ;;  %v213_v1 = vld [vmem:[%s1634_s1 + $0x18] sm:$0xff]  ;;  %v210_v2 = vld [vmem:[%s1634_s1] sm:$0xff] }
   0x2   :  { %v870_v3 = vpack.c.bf16 %v213_v1, %v211_v0  ;;  %v212_v4 = vld [vmem:[%s1634_s1 + $0x10] sm:$0xff]  ;;  %v215_v5 = vld [vmem:[%s1634_s1 + $0x28] sm:$0xff]  ;;  %v217_v6 = vld [vmem:[%s1634_s1 + $0x38] sm:$0xff] }
   0x3   :  { %v872_v7 = vpack.c.bf16 %v212_v4, %v210_v2  ;;  %v874_v8 = vpack.c.bf16 %v217_v6, %v215_v5  ;;  %v214_v9 = vld [vmem:[%s1634_s1 + $0x20] sm:$0xff]  ;;  %v216_v10 = vld [vmem:[%s1634_s1 + $0x30] sm:$0xff]  ;;  %v219_v11 = vld [vmem:[%s1634_s1 + $0x48] sm:$0xff] }
   0x4   :  { %871 = vmatprep.subr.bf16.mxu0 %v870_v3  ;;  %934 = vmatprep.subr.bf16.mxu1 %v870_v3  ;;  %v221_v12 = vld [vmem:[%s1634_s1 + $0x58] sm:$0xff]  ;;  %v876_v13 = vpack.c.bf16 %v216_v10, %v214_v9  ;;  %v218_v15 = vld [vmem:[%s1634_s1 + $0x40] sm:$0xff]  ;;  %v220_v16 = vld [vmem:[%s1634_s1 + $0x50] sm:$0xff] }
   0x5   :  { %873 = vmatpush1.bf16.msra.mxu0 %v872_v7  ;;  %950 = vmatpush1.bf16.msra.mxu1 %v872_v7  ;;  %v878_v14 = vpack.c.bf16 %v221_v12, %v219_v11  ;;  %v223_v17 = vld [vmem:[%s1634_s1 + $0x68] sm:$0xff]  ;;  %v225_v18 = vld [vmem:[%s1634_s1 + $0x78] sm:$0xff]  ;;  %v880_v19 = vpack.c.bf16 %v220_v16, %v218_v15  ;;  %v222_v21 = vld [vmem:[%s1634_s1 + $0x60] sm:$0xff] }
   0x6   :  { %875 = vmatprep.subr.bf16.mxu0 %v874_v8  ;;  %935 = vmatprep.subr.bf16.mxu1 %v874_v8  ;;  %v882_v20 = vpack.c.bf16 %v225_v18, %v223_v17  ;;  %v224_v22 = vld [vmem:[%s1634_s1 + $0x70] sm:$0xff]  ;;  %v227_v23 = vld [vmem:[%s1634_s1 + $0x88] sm:$0xff]  ;;  %v229_v24 = vld [vmem:[%s1634_s1 + $0x98] sm:$0xff] }
   0x7   :  { %v884_v25 = vpack.c.bf16 %v224_v22, %v222_v21  ;;  %v886_v26 = vpack.c.bf16 %v229_v24, %v227_v23  ;;  %v226_v27 = vld [vmem:[%s1634_s1 + $0x80] sm:$0xff]  ;;  %v228_v28 = vld [vmem:[%s1634_s1 + $0x90] sm:$0xff]  ;;  %v231_v29 = vld [vmem:[%s1634_s1 + $0xa8] sm:$0xff] }
   0x8   :  { %v233_v30 = vld [vmem:[%s1634_s1 + $0xb8] sm:$0xff]  ;;  %v888_v31 = vpack.c.bf16 %v228_v28, %v226_v27  ;;  %v230_v33 = vld [vmem:[%s1634_s1 + $0xa0] sm:$0xff]  ;;  %v232_v34 = vld [vmem:[%s1634_s1 + $0xb0] sm:$0xff] }
   0x9   :  { %877 = vmatpush1.bf16.msra.mxu0 %v876_v13  ;;  %951 = vmatpush1.bf16.msra.mxu1 %v876_v13  ;;  %v890_v32 = vpack.c.bf16 %v233_v30, %v231_v29  ;;  %v235_v35 = vld [vmem:[%s1634_s1 + $0xc8] sm:$0xff]  ;;  %v237_v36 = vld [vmem:[%s1634_s1 + $0xd8] sm:$0xff]  ;;  %v892_v37 = vpack.c.bf16 %v232_v34, %v230_v33  ;;  %v234_v38 = vld [vmem:[%s1634_s1 + $0xc0] sm:$0xff] }
   0xa   :  { %879 = vmatprep.subr.bf16.mxu0 %v878_v14  ;;  %936 = vmatprep.subr.bf16.mxu1 %v878_v14  ;;  %v894_v39 = vpack.c.bf16 %v237_v36, %v235_v35  ;;  %v236_v40 = vld [vmem:[%s1634_s1 + $0xd0] sm:$0xff]  ;;  %v147_v41 = vld [vmem:[%s1635_s0 + $0x8] sm:$0xff]  ;;  %v241_v44 = vld [vmem:[%s1634_s1 + $0xf8] sm:$0xff] }
   0xb   :  { %v179_v42 = vld [vmem:[%s1635_s0 + $0x108] sm:$0xff]  ;;  %338 = vmatprep.mubr.f32.mxu0 %v147_v41  ;;  %v896_v45 = vpack.c.bf16 %v236_v40, %v234_v38  ;;  %v238_v47 = vld [vmem:[%s1634_s1 + $0xe0] sm:$0xff]  ;;  %v240_v48 = vld [vmem:[%s1634_s1 + $0xf0] sm:$0xff] }
   0xc   :  { %v239_v43 = vld [vmem:[%s1634_s1 + $0xe8] sm:$0xff]  ;;  %434 = vmatprep.mubr.f32.mxu1 %v179_v42  ;;  %v245_v50 = vld [vmem:[%s1634_s1 + $0x118] sm:$0xff]  ;;  %v900_v51 = vpack.c.bf16 %v240_v48, %v238_v47  ;;  %v242_v53 = vld [vmem:[%s1634_s1 + $0x100] sm:$0xff] }
   0xd   :  { %881 = vmatpush1.bf16.msra.mxu0 %v880_v19  ;;  %952 = vmatpush1.bf16.msra.mxu1 %v880_v19  ;;  %v898_v46 = vpack.c.bf16 %v241_v44, %v239_v43  ;;  %v243_v49 = vld [vmem:[%s1634_s1 + $0x108] sm:$0xff]  ;;  %v244_v54 = vld [vmem:[%s1634_s1 + $0x110] sm:$0xff]  ;;  %v249_v56 = vld [vmem:[%s1634_s1 + $0x138] sm:$0xff] }
   0xe   :  { %883 = vmatprep.subr.bf16.mxu0 %v882_v20  ;;  %937 = vmatprep.subr.bf16.mxu1 %v882_v20  ;;  %v902_v52 = vpack.c.bf16 %v245_v50, %v243_v49  ;;  %v247_v55 = vld [vmem:[%s1634_s1 + $0x128] sm:$0xff]  ;;  %v904_v57 = vpack.c.bf16 %v244_v54, %v242_v53  ;;  %v246_v59 = vld [vmem:[%s1634_s1 + $0x120] sm:$0xff]  ;;  %v248_v60 = vld [vmem:[%s1634_s1 + $0x130] sm:$0xff] }
   0xf   :  { %v906_v58 = vpack.c.bf16 %v249_v56, %v247_v55  ;;  %v251_v61 = vld [vmem:[%s1634_s1 + $0x148] sm:$0xff]  ;;  %v253_v62 = vld [vmem:[%s1634_s1 + $0x158] sm:$0xff]  ;;  %v908_v63 = vpack.c.bf16 %v248_v60, %v246_v59  ;;  %v250_v1 = vld [vmem:[%s1634_s1 + $0x140] sm:$0xff] }
  0x10   :  { %v910_v0 = vpack.c.bf16 %v253_v62, %v251_v61  ;;  %v252_v2 = vld [vmem:[%s1634_s1 + $0x150] sm:$0xff]  ;;  %v255_v3 = vld [vmem:[%s1634_s1 + $0x168] sm:$0xff]  ;;  %v257_v4 = vld [vmem:[%s1634_s1 + $0x178] sm:$0xff] }
  0x11   :  { %885 = vmatpush1.bf16.msra.mxu0 %v884_v25  ;;  %953 = vmatpush1.bf16.msra.mxu1 %v884_v25  ;;  %v912_v5 = vpack.c.bf16 %v252_v2, %v250_v1  ;;  %v914_v6 = vpack.c.bf16 %v257_v4, %v255_v3  ;;  %v254_v7 = vld [vmem:[%s1634_s1 + $0x160] sm:$0xff]  ;;  %v256_v8 = vld [vmem:[%s1634_s1 + $0x170] sm:$0xff]  ;;  %v259_v9 = vld [vmem:[%s1634_s1 + $0x188] sm:$0xff] }
  0x12   :  { %887 = vmatprep.subr.bf16.mxu0 %v886_v26  ;;  %938 = vmatprep.subr.bf16.mxu1 %v886_v26  ;;  %v261_v10 = vld [vmem:[%s1634_s1 + $0x198] sm:$0xff]  ;;  %v916_v11 = vpack.c.bf16 %v256_v8, %v254_v7  ;;  %v258_v13 = vld [vmem:[%s1634_s1 + $0x180] sm:$0xff]  ;;  %v260_v14 = vld [vmem:[%s1634_s1 + $0x190] sm:$0xff] }
  0x13   :  { %v918_v12 = vpack.c.bf16 %v261_v10, %v259_v9  ;;  %v263_v15 = vld [vmem:[%s1634_s1 + $0x1a8] sm:$0xff]  ;;  %v265_v16 = vld [vmem:[%s1634_s1 + $0x1b8] sm:$0xff]  ;;  %v920_v17 = vpack.c.bf16 %v260_v14, %v258_v13  ;;  %v262_v19 = vld [vmem:[%s1634_s1 + $0x1a0] sm:$0xff] }
  0x14   :  { %v922_v18 = vpack.c.bf16 %v265_v16, %v263_v15  ;;  %v264_v20 = vld [vmem:[%s1634_s1 + $0x1b0] sm:$0xff]  ;;  %v267_v21 = vld [vmem:[%s1634_s1 + $0x1c8] sm:$0xff]  ;;  %v269_v22 = vld [vmem:[%s1634_s1 + $0x1d8] sm:$0xff] }
  0x15   :  { %889 = vmatpush1.bf16.msra.mxu0 %v888_v31  ;;  %954 = vmatpush1.bf16.msra.mxu1 %v888_v31  ;;  %v924_v23 = vpack.c.bf16 %v264_v20, %v262_v19  ;;  %v926_v24 = vpack.c.bf16 %v269_v22, %v267_v21  ;;  %v266_v25 = vld [vmem:[%s1634_s1 + $0x1c0] sm:$0xff]  ;;  %v268_v26 = vld [vmem:[%s1634_s1 + $0x1d0] sm:$0xff]  ;;  %v271_v27 = vld [vmem:[%s1634_s1 + $0x1e8] sm:$0xff] }
  0x16   :  { %891 = vmatprep.subr.bf16.mxu0 %v890_v32  ;;  %939 = vmatprep.subr.bf16.mxu1 %v890_v32  ;;  %v273_v28 = vld [vmem:[%s1634_s1 + $0x1f8] sm:$0xff]  ;;  %v928_v29 = vpack.c.bf16 %v268_v26, %v266_v25  ;;  %v270_v31 = vld [vmem:[%s1634_s1 + $0x1e0] sm:$0xff]  ;;  %v272_v32 = vld [vmem:[%s1634_s1 + $0x1f0] sm:$0xff] }
  0x17   :  { %v930_v30 = vpack.c.bf16 %v273_v28, %v271_v27  ;;  %v932_v33 = vpack.c.bf16 %v272_v32, %v270_v31  ;;  %v146_v34 = vld [vmem:[%s1635_s0] sm:$0xff]  ;;  %v149_v36 = vld [vmem:[%s1635_s0 + $0x18] sm:$0xff]  ;;  %v148_v38 = vld [vmem:[%s1635_s0 + $0x10] sm:$0xff]  ;;  %v728_v32 = vlaneseq }
  0x18   :  { %v178_v35 = vld [vmem:[%s1635_s0 + $0x100] sm:$0xff]  ;;  %v151_v40 = vld [vmem:[%s1635_s0 + $0x28] sm:$0xff]  ;;  %v153_v44 = vld [vmem:[%s1635_s0 + $0x38] sm:$0xff] }
  0x19   :  { %893 = vmatpush1.bf16.msra.mxu0 %v892_v37  ;;  %955 = vmatpush1.bf16.msra.mxu1 %v892_v37  ;;  %v181_v37 = vld [vmem:[%s1635_s0 + $0x118] sm:$0xff]  ;;  %v183_v41 = vld [vmem:[%s1635_s0 + $0x128] sm:$0xff]  ;;  %v150_v42 = vld [vmem:[%s1635_s0 + $0x20] sm:$0xff] }
  0x1a   :  { %895 = vmatprep.subr.bf16.mxu0 %v894_v39  ;;  %940 = vmatprep.subr.bf16.mxu1 %v894_v39  ;;  %v180_v39 = vld [vmem:[%s1635_s0 + $0x110] sm:$0xff]  ;;  %v182_v43 = vld [vmem:[%s1635_s0 + $0x120] sm:$0xff]  ;;  %v155_v48 = vld [vmem:[%s1635_s0 + $0x48] sm:$0xff] }
  0x1b   :  { %v184_v47 = vld [vmem:[%s1635_s0 + $0x130] sm:$0xff]  ;;  %v187_v49 = vld [vmem:[%s1635_s0 + $0x148] sm:$0xff]  ;;  %v154_v50 = vld [vmem:[%s1635_s0 + $0x40] sm:$0xff] }
  0x1c   :  { %v189_v53 = vld [vmem:[%s1635_s0 + $0x158] sm:$0xff]  ;;  %v156_v54 = vld [vmem:[%s1635_s0 + $0x50] sm:$0xff]  ;;  %v159_v56 = vld [vmem:[%s1635_s0 + $0x68] sm:$0xff] }
  0x1d   :  { %897 = vmatpush1.bf16.msra.mxu0 %v896_v45  ;;  %956 = vmatpush1.bf16.msra.mxu1 %v896_v45  ;;  %v185_v45 = vld [vmem:[%s1635_s0 + $0x138] sm:$0xff]  ;;  %v188_v55 = vld [vmem:[%s1635_s0 + $0x150] sm:$0xff]  ;;  %v190_v59 = vld [vmem:[%s1635_s0 + $0x160] sm:$0xff] }
  0x1e   :  { %899 = vmatprep.subr.bf16.mxu0 %v898_v46  ;;  %941 = vmatprep.subr.bf16.mxu1 %v898_v46  ;;  %v152_v46 = vld [vmem:[%s1635_s0 + $0x30] sm:$0xff]  ;;  %v161_v60 = vld [vmem:[%s1635_s0 + $0x78] sm:$0xff]  ;;  %v195_v1 = vld [vmem:[%s1635_s0 + $0x188] sm:$0xff] }
  0x1f   :  { %v193_v61 = vld [vmem:[%s1635_s0 + $0x178] sm:$0xff]  ;;  %v160_v62 = vld [vmem:[%s1635_s0 + $0x70] sm:$0xff]  ;;  %v162_v2 = vld [vmem:[%s1635_s0 + $0x80] sm:$0xff] }
  0x20   :  { %v194_v3 = vld [vmem:[%s1635_s0 + $0x180] sm:$0xff]  ;;  %v165_v4 = vld [vmem:[%s1635_s0 + $0x98] sm:$0xff]  ;;  %v196_v7 = vld [vmem:[%s1635_s0 + $0x190] sm:$0xff] }
  0x21   :  { %901 = vmatpush1.bf16.msra.mxu0 %v900_v51  ;;  %957 = vmatpush1.bf16.msra.mxu1 %v900_v51  ;;  %v186_v51 = vld [vmem:[%s1635_s0 + $0x140] sm:$0xff]  ;;  %v167_v8 = vld [vmem:[%s1635_s0 + $0xa8] sm:$0xff]  ;;  %v201_v13 = vld [vmem:[%s1635_s0 + $0x1b8] sm:$0xff] }
  0x22   :  { %903 = vmatprep.subr.bf16.mxu0 %v902_v52  ;;  %942 = vmatprep.subr.bf16.mxu1 %v902_v52  ;;  %v157_v52 = vld [vmem:[%s1635_s0 + $0x58] sm:$0xff]  ;;  %v199_v9 = vld [vmem:[%s1635_s0 + $0x1a8] sm:$0xff]  ;;  %v166_v10 = vld [vmem:[%s1635_s0 + $0xa0] sm:$0xff] }
  0x23   :  { %v168_v14 = vld [vmem:[%s1635_s0 + $0xb0] sm:$0xff]  ;;  %v171_v16 = vld [vmem:[%s1635_s0 + $0xc8] sm:$0xff]  ;;  %v202_v19 = vld [vmem:[%s1635_s0 + $0x1c0] sm:$0xff] }
  0x24   :  { %v200_v15 = vld [vmem:[%s1635_s0 + $0x1b0] sm:$0xff]  ;;  %v173_v20 = vld [vmem:[%s1635_s0 + $0xd8] sm:$0xff]  ;;  %v207_v25 = vld [vmem:[%s1635_s0 + $0x1e8] sm:$0xff] }
  0x25   :  { %905 = vmatpush1.bf16.msra.mxu0 %v904_v57  ;;  %958 = vmatpush1.bf16.msra.mxu1 %v904_v57  ;;  %v191_v57 = vld [vmem:[%s1635_s0 + $0x168] sm:$0xff]  ;;  %v205_v21 = vld [vmem:[%s1635_s0 + $0x1d8] sm:$0xff]  ;;  %v172_v22 = vld [vmem:[%s1635_s0 + $0xd0] sm:$0xff] }
  0x26   :  { %907 = vmatprep.subr.bf16.mxu0 %v906_v58  ;;  %943 = vmatprep.subr.bf16.mxu1 %v906_v58  ;;  %v158_v58 = vld [vmem:[%s1635_s0 + $0x60] sm:$0xff]  ;;  %v177_v28 = vld [vmem:[%s1635_s0 + $0xf8] sm:$0xff]  ;;  %v208_v31 = vld [vmem:[%s1635_s0 + $0x1f0] sm:$0xff] }
  0x27   :  { %v174_v26 = vld [vmem:[%s1635_s0 + $0xe0] sm:$0xff] }
  0x28   :  { %v206_v27 = vld [vmem:[%s1635_s0 + $0x1e0] sm:$0xff] }
  0x29   :  { %909 = vmatpush1.bf16.msra.mxu0 %v908_v63  ;;  %959 = vmatpush1.bf16.msra.mxu1 %v908_v63  ;;  %v192_v63 = vld [vmem:[%s1635_s0 + $0x170] sm:$0xff] }
  0x2a   :  { %911 = vmatprep.subr.bf16.mxu0 %v910_v0  ;;  %944 = vmatprep.subr.bf16.mxu1 %v910_v0  ;;  %v163_v0 = vld [vmem:[%s1635_s0 + $0x88] sm:$0xff] }
  0x2d   :  { %913 = vmatpush1.bf16.msra.mxu0 %v912_v5  ;;  %960 = vmatpush1.bf16.msra.mxu1 %v912_v5  ;;  %v197_v5 = vld [vmem:[%s1635_s0 + $0x198] sm:$0xff] }
  0x2e   :  { %915 = vmatprep.subr.bf16.mxu0 %v914_v6  ;;  %945 = vmatprep.subr.bf16.mxu1 %v914_v6  ;;  %v164_v6 = vld [vmem:[%s1635_s0 + $0x90] sm:$0xff] }
  0x31   :  { %917 = vmatpush1.bf16.msra.mxu0 %v916_v11  ;;  %961 = vmatpush1.bf16.msra.mxu1 %v916_v11  ;;  %v198_v11 = vld [vmem:[%s1635_s0 + $0x1a0] sm:$0xff] }
  0x32   :  { %919 = vmatprep.subr.bf16.mxu0 %v918_v12  ;;  %946 = vmatprep.subr.bf16.mxu1 %v918_v12  ;;  %v169_v12 = vld [vmem:[%s1635_s0 + $0xb8] sm:$0xff] }
  0x35   :  { %921 = vmatpush1.bf16.msra.mxu0 %v920_v17  ;;  %962 = vmatpush1.bf16.msra.mxu1 %v920_v17  ;;  %v203_v17 = vld [vmem:[%s1635_s0 + $0x1c8] sm:$0xff] }
  0x36   :  { %923 = vmatprep.subr.bf16.mxu0 %v922_v18  ;;  %947 = vmatprep.subr.bf16.mxu1 %v922_v18  ;;  %v170_v18 = vld [vmem:[%s1635_s0 + $0xc0] sm:$0xff] }
  0x39   :  { %925 = vmatpush1.bf16.msra.mxu0 %v924_v23  ;;  %963 = vmatpush1.bf16.msra.mxu1 %v924_v23  ;;  %v204_v23 = vld [vmem:[%s1635_s0 + $0x1d0] sm:$0xff] }
  0x3a   :  { %927 = vmatprep.subr.bf16.mxu0 %v926_v24  ;;  %948 = vmatprep.subr.bf16.mxu1 %v926_v24  ;;  %v175_v24 = vld [vmem:[%s1635_s0 + $0xe8] sm:$0xff] }
  0x3d   :  { %929 = vmatpush1.bf16.msra.mxu0 %v928_v29  ;;  %964 = vmatpush1.bf16.msra.mxu1 %v928_v29  ;;  %v209_v29 = vld [vmem:[%s1635_s0 + $0x1f8] sm:$0xff] }
  0x3e   :  { %931 = vmatprep.subr.bf16.mxu0 %v930_v30  ;;  %949 = vmatprep.subr.bf16.mxu1 %v930_v30  ;;  %v176_v30 = vld [vmem:[%s1635_s0 + $0xf0] sm:$0xff] }
  0x41   :  { %933 = vmatpush1.bf16.msra.mxu0 %v932_v33  ;;  %965 = vmatpush1.bf16.msra.mxu1 %v932_v33  ;;  %v729_v33 = vshrl.u32 %v728_v32, 7 }
  0x44   :  { %339 = vmatmul.mubr.f32.vlgmr.msra.gmra.mrb[0].mxu0 %v146_v34  ;;  %435 = vmatmul.mubr.f32.vlgmr.msra.gmra.mrb[0].mxu1 %v178_v35  ;;  %v730_v34 = vsub.s32 0, %v729_v33  ;;  %v726_v35 = vld [vmem:[%s1636_s2] sm:$0x3] }
  0x45   :  { %344 = vmatprep.mubr.f32.mxu0 %v149_v36  ;;  %440 = vmatprep.mubr.f32.mxu1 %v181_v37  ;;  %v734_v36 = vsub.s32 1, %v729_v33 }
  0x46   :  { %v1374_v37 = vrot.slane %v726_v35, %v730_v34 }
  0x48   :  { %345 = vmatmul.mubr.f32.gmra.mrb[2].mxu0 %v148_v38  ;;  %441 = vmatmul.mubr.f32.gmra.mrb[2].mxu1 %v180_v39 }
  0x49   :  { %350 = vmatprep.mubr.f32.mxu0 %v151_v40  ;;  %446 = vmatprep.mubr.f32.mxu1 %v183_v41  ;;  %v1376_v40 = vrot.slane %v726_v35, %v734_v36 }
  0x4c   :  { %351 = vmatmul.mubr.f32.gmra.mrb[4].mxu0 %v150_v42  ;;  %447 = vmatmul.mubr.f32.gmra.mrb[4].mxu1 %v182_v43 }
  0x4d   :  { %356 = vmatprep.mubr.f32.mxu0 %v153_v44  ;;  %452 = vmatprep.mubr.f32.mxu1 %v185_v45 }
  0x50   :  { %357 = vmatmul.mubr.f32.gmra.mrb[6].mxu0 %v152_v46  ;;  %453 = vmatmul.mubr.f32.gmra.mrb[6].mxu1 %v184_v47 }
  0x51   :  { %362 = vmatprep.mubr.f32.mxu0 %v155_v48  ;;  %458 = vmatprep.mubr.f32.mxu1 %v187_v49 }
  0x54   :  { %363 = vmatmul.mubr.f32.gmra.mrb[8].mxu0 %v154_v50  ;;  %459 = vmatmul.mubr.f32.gmra.mrb[8].mxu1 %v186_v51 }
  0x55   :  { %368 = vmatprep.mubr.f32.mxu0 %v157_v52  ;;  %464 = vmatprep.mubr.f32.mxu1 %v189_v53 }
  0x58   :  { %369 = vmatmul.mubr.f32.gmra.mrb[10].mxu0 %v156_v54  ;;  %465 = vmatmul.mubr.f32.gmra.mrb[10].mxu1 %v188_v55 }
  0x59   :  { %374 = vmatprep.mubr.f32.mxu0 %v159_v56  ;;  %470 = vmatprep.mubr.f32.mxu1 %v191_v57 }
  0x5c   :  { %375 = vmatmul.mubr.f32.gmra.mrb[12].mxu0 %v158_v58  ;;  %471 = vmatmul.mubr.f32.gmra.mrb[12].mxu1 %v190_v59 }
  0x5d   :  { %380 = vmatprep.mubr.f32.mxu0 %v161_v60  ;;  %476 = vmatprep.mubr.f32.mxu1 %v193_v61 }
  0x60   :  { %381 = vmatmul.mubr.f32.gmra.mrb[14].mxu0 %v160_v62  ;;  %477 = vmatmul.mubr.f32.gmra.mrb[14].mxu1 %v192_v63 }
  0x61   :  { %386 = vmatprep.mubr.f32.mxu0 %v163_v0  ;;  %482 = vmatprep.mubr.f32.mxu1 %v195_v1 }
  0x64   :  { %387 = vmatmul.mubr.f32.gmra.mrb[16].mxu0 %v162_v2  ;;  %483 = vmatmul.mubr.f32.gmra.mrb[16].mxu1 %v194_v3 }
  0x65   :  { %392 = vmatprep.mubr.f32.mxu0 %v165_v4  ;;  %488 = vmatprep.mubr.f32.mxu1 %v197_v5 }
  0x68   :  { %393 = vmatmul.mubr.f32.gmra.mrb[18].mxu0 %v164_v6  ;;  %489 = vmatmul.mubr.f32.gmra.mrb[18].mxu1 %v196_v7 }
  0x69   :  { %398 = vmatprep.mubr.f32.mxu0 %v167_v8  ;;  %494 = vmatprep.mubr.f32.mxu1 %v199_v9 }
  0x6c   :  { %399 = vmatmul.mubr.f32.gmra.mrb[20].mxu0 %v166_v10  ;;  %495 = vmatmul.mubr.f32.gmra.mrb[20].mxu1 %v198_v11 }
  0x6d   :  { %404 = vmatprep.mubr.f32.mxu0 %v169_v12  ;;  %500 = vmatprep.mubr.f32.mxu1 %v201_v13 }
  0x70   :  { %405 = vmatmul.mubr.f32.gmra.mrb[22].mxu0 %v168_v14  ;;  %501 = vmatmul.mubr.f32.gmra.mrb[22].mxu1 %v200_v15 }
  0x71   :  { %410 = vmatprep.mubr.f32.mxu0 %v171_v16  ;;  %506 = vmatprep.mubr.f32.mxu1 %v203_v17 }
  0x74   :  { %411 = vmatmul.mubr.f32.gmra.mrb[24].mxu0 %v170_v18  ;;  %507 = vmatmul.mubr.f32.gmra.mrb[24].mxu1 %v202_v19 }
  0x75   :  { %416 = vmatprep.mubr.f32.mxu0 %v173_v20  ;;  %512 = vmatprep.mubr.f32.mxu1 %v205_v21 }
  0x78   :  { %417 = vmatmul.mubr.f32.gmra.mrb[26].mxu0 %v172_v22  ;;  %513 = vmatmul.mubr.f32.gmra.mrb[26].mxu1 %v204_v23 }
  0x79   :  { %422 = vmatprep.mubr.f32.mxu0 %v175_v24  ;;  %518 = vmatprep.mubr.f32.mxu1 %v207_v25 }
  0x7c   :  { %423 = vmatmul.mubr.f32.gmra.mrb[28].mxu0 %v174_v26  ;;  %519 = vmatmul.mubr.f32.gmra.mrb[28].mxu1 %v206_v27 }
  0x7d   :  { %428 = vmatprep.mubr.f32.mxu0 %v177_v28  ;;  %524 = vmatprep.mubr.f32.mxu1 %v209_v29 }
  0x80   :  { %429 = vmatmul.mubr.f32.gmra.mrb[30].mxu0 %v176_v30  ;;  %525 = vmatmul.mubr.f32.gmra.mrb[30].mxu1 %v208_v31 }
 0x117   :  { %v340_v38 = vpop.f32.mrb[0].mxu0  ;;  %v436_v39 = vpop.f32.mrb[0].mxu1 }
 0x118   :  { %v342_v41 = vpop.f32.mrb[1].mxu0  ;;  %v438_v42 = vpop.f32.mrb[1].mxu1  ;;  %v738_v43 = vadd.f32 %v1374_v37, %v340_v38  ;;  %v770_v44 = vadd.f32 %v1374_v37, %v436_v39 }
 0x119   :  { %v739_v45 = vadd.f32 %v1376_v40, %v342_v41  ;;  %v771_v46 = vadd.f32 %v1376_v40, %v438_v42 }
 0x11a   :  { %802 = vst [vmem:[%s1637_s3] sm:$0xff] %v738_v43  ;;  %834 = vst [vmem:[%s1637_s3 + $0x100] sm:$0xff] %v770_v44 }
 0x11b   :  { %v346_v47 = vpop.f32.mrb[2].mxu0  ;;  %v442_v48 = vpop.f32.mrb[2].mxu1  ;;  %803 = vst [vmem:[%s1637_s3 + $0x8] sm:$0xff] %v739_v45  ;;  %835 = vst [vmem:[%s1637_s3 + $0x108] sm:$0xff] %v771_v46 }
 0x11c   :  { %v348_v49 = vpop.f32.mrb[3].mxu0  ;;  %v444_v50 = vpop.f32.mrb[3].mxu1  ;;  %v740_v51 = vadd.f32 %v1374_v37, %v346_v47  ;;  %v772_v52 = vadd.f32 %v1374_v37, %v442_v48 }
 0x11d   :  { %v741_v53 = vadd.f32 %v1376_v40, %v348_v49  ;;  %v773_v54 = vadd.f32 %v1376_v40, %v444_v50 }
 0x11e   :  { %804 = vst [vmem:[%s1637_s3 + $0x10] sm:$0xff] %v740_v51  ;;  %836 = vst [vmem:[%s1637_s3 + $0x110] sm:$0xff] %v772_v52 }
 0x11f   :  { %v352_v55 = vpop.f32.mrb[4].mxu0  ;;  %v448_v56 = vpop.f32.mrb[4].mxu1  ;;  %805 = vst [vmem:[%s1637_s3 + $0x18] sm:$0xff] %v741_v53  ;;  %837 = vst [vmem:[%s1637_s3 + $0x118] sm:$0xff] %v773_v54 }
 0x120   :  { %v354_v57 = vpop.f32.mrb[5].mxu0  ;;  %v450_v58 = vpop.f32.mrb[5].mxu1  ;;  %v742_v59 = vadd.f32 %v1374_v37, %v352_v55  ;;  %v774_v60 = vadd.f32 %v1374_v37, %v448_v56 }
 0x121   :  { %v743_v61 = vadd.f32 %v1376_v40, %v354_v57  ;;  %v775_v62 = vadd.f32 %v1376_v40, %v450_v58 }
 0x122   :  { %806 = vst [vmem:[%s1637_s3 + $0x20] sm:$0xff] %v742_v59  ;;  %838 = vst [vmem:[%s1637_s3 + $0x120] sm:$0xff] %v774_v60 }
 0x123   :  { %v358_v63 = vpop.f32.mrb[6].mxu0  ;;  %v454_v0 = vpop.f32.mrb[6].mxu1  ;;  %807 = vst [vmem:[%s1637_s3 + $0x28] sm:$0xff] %v743_v61  ;;  %839 = vst [vmem:[%s1637_s3 + $0x128] sm:$0xff] %v775_v62 }
 0x124   :  { %v360_v1 = vpop.f32.mrb[7].mxu0  ;;  %v456_v2 = vpop.f32.mrb[7].mxu1  ;;  %v744_v3 = vadd.f32 %v1374_v37, %v358_v63  ;;  %v776_v4 = vadd.f32 %v1374_v37, %v454_v0 }
 0x125   :  { %v745_v5 = vadd.f32 %v1376_v40, %v360_v1  ;;  %v777_v6 = vadd.f32 %v1376_v40, %v456_v2 }
 0x126   :  { %808 = vst [vmem:[%s1637_s3 + $0x30] sm:$0xff] %v744_v3  ;;  %840 = vst [vmem:[%s1637_s3 + $0x130] sm:$0xff] %v776_v4 }
 0x127   :  { %v364_v7 = vpop.f32.mrb[8].mxu0  ;;  %v460_v8 = vpop.f32.mrb[8].mxu1  ;;  %809 = vst [vmem:[%s1637_s3 + $0x38] sm:$0xff] %v745_v5  ;;  %841 = vst [vmem:[%s1637_s3 + $0x138] sm:$0xff] %v777_v6 }
 0x128   :  { %v366_v9 = vpop.f32.mrb[9].mxu0  ;;  %v462_v10 = vpop.f32.mrb[9].mxu1  ;;  %v746_v11 = vadd.f32 %v1374_v37, %v364_v7  ;;  %v778_v12 = vadd.f32 %v1374_v37, %v460_v8 }
 0x129   :  { %v747_v13 = vadd.f32 %v1376_v40, %v366_v9  ;;  %v779_v14 = vadd.f32 %v1376_v40, %v462_v10 }
 0x12a   :  { %810 = vst [vmem:[%s1637_s3 + $0x40] sm:$0xff] %v746_v11  ;;  %842 = vst [vmem:[%s1637_s3 + $0x140] sm:$0xff] %v778_v12 }
 0x12b   :  { %v370_v15 = vpop.f32.mrb[10].mxu0  ;;  %v466_v16 = vpop.f32.mrb[10].mxu1  ;;  %811 = vst [vmem:[%s1637_s3 + $0x48] sm:$0xff] %v747_v13  ;;  %843 = vst [vmem:[%s1637_s3 + $0x148] sm:$0xff] %v779_v14 }
 0x12c   :  { %v372_v17 = vpop.f32.mrb[11].mxu0  ;;  %v468_v18 = vpop.f32.mrb[11].mxu1  ;;  %v748_v19 = vadd.f32 %v1374_v37, %v370_v15  ;;  %v780_v20 = vadd.f32 %v1374_v37, %v466_v16 }
 0x12d   :  { %v749_v21 = vadd.f32 %v1376_v40, %v372_v17  ;;  %v781_v22 = vadd.f32 %v1376_v40, %v468_v18 }
 0x12e   :  { %812 = vst [vmem:[%s1637_s3 + $0x50] sm:$0xff] %v748_v19  ;;  %844 = vst [vmem:[%s1637_s3 + $0x150] sm:$0xff] %v780_v20 }
 0x12f   :  { %v376_v23 = vpop.f32.mrb[12].mxu0  ;;  %v472_v24 = vpop.f32.mrb[12].mxu1  ;;  %813 = vst [vmem:[%s1637_s3 + $0x58] sm:$0xff] %v749_v21  ;;  %845 = vst [vmem:[%s1637_s3 + $0x158] sm:$0xff] %v781_v22 }
 0x130   :  { %v378_v25 = vpop.f32.mrb[13].mxu0  ;;  %v474_v26 = vpop.f32.mrb[13].mxu1  ;;  %v750_v27 = vadd.f32 %v1374_v37, %v376_v23  ;;  %v782_v28 = vadd.f32 %v1374_v37, %v472_v24 }
 0x131   :  { %v751_v29 = vadd.f32 %v1376_v40, %v378_v25  ;;  %v783_v30 = vadd.f32 %v1376_v40, %v474_v26 }
 0x132   :  { %814 = vst [vmem:[%s1637_s3 + $0x60] sm:$0xff] %v750_v27  ;;  %846 = vst [vmem:[%s1637_s3 + $0x160] sm:$0xff] %v782_v28 }
 0x133   :  { %v382_v31 = vpop.f32.mrb[14].mxu0  ;;  %v478_v32 = vpop.f32.mrb[14].mxu1  ;;  %815 = vst [vmem:[%s1637_s3 + $0x68] sm:$0xff] %v751_v29  ;;  %847 = vst [vmem:[%s1637_s3 + $0x168] sm:$0xff] %v783_v30 }
 0x134   :  { %v384_v33 = vpop.f32.mrb[15].mxu0  ;;  %v480_v34 = vpop.f32.mrb[15].mxu1  ;;  %v752_v35 = vadd.f32 %v1374_v37, %v382_v31  ;;  %v784_v36 = vadd.f32 %v1374_v37, %v478_v32 }
 0x135   :  { %v753_v38 = vadd.f32 %v1376_v40, %v384_v33  ;;  %v785_v39 = vadd.f32 %v1376_v40, %v480_v34 }
 0x136   :  { %816 = vst [vmem:[%s1637_s3 + $0x70] sm:$0xff] %v752_v35  ;;  %848 = vst [vmem:[%s1637_s3 + $0x170] sm:$0xff] %v784_v36 }
 0x137   :  { %v388_v41 = vpop.f32.mrb[16].mxu0  ;;  %v484_v42 = vpop.f32.mrb[16].mxu1  ;;  %817 = vst [vmem:[%s1637_s3 + $0x78] sm:$0xff] %v753_v38  ;;  %849 = vst [vmem:[%s1637_s3 + $0x178] sm:$0xff] %v785_v39 }
 0x138   :  { %v390_v43 = vpop.f32.mrb[17].mxu0  ;;  %v486_v44 = vpop.f32.mrb[17].mxu1  ;;  %v754_v45 = vadd.f32 %v1374_v37, %v388_v41  ;;  %v786_v46 = vadd.f32 %v1374_v37, %v484_v42 }
 0x139   :  { %v755_v47 = vadd.f32 %v1376_v40, %v390_v43  ;;  %v787_v48 = vadd.f32 %v1376_v40, %v486_v44 }
 0x13a   :  { %818 = vst [vmem:[%s1637_s3 + $0x80] sm:$0xff] %v754_v45  ;;  %850 = vst [vmem:[%s1637_s3 + $0x180] sm:$0xff] %v786_v46 }
 0x13b   :  { %v394_v49 = vpop.f32.mrb[18].mxu0  ;;  %v490_v50 = vpop.f32.mrb[18].mxu1  ;;  %819 = vst [vmem:[%s1637_s3 + $0x88] sm:$0xff] %v755_v47  ;;  %851 = vst [vmem:[%s1637_s3 + $0x188] sm:$0xff] %v787_v48 }
 0x13c   :  { %v396_v51 = vpop.f32.mrb[19].mxu0  ;;  %v492_v52 = vpop.f32.mrb[19].mxu1  ;;  %v756_v53 = vadd.f32 %v1374_v37, %v394_v49  ;;  %v788_v54 = vadd.f32 %v1374_v37, %v490_v50 }
 0x13d   :  { %v757_v55 = vadd.f32 %v1376_v40, %v396_v51  ;;  %v789_v56 = vadd.f32 %v1376_v40, %v492_v52 }
 0x13e   :  { %820 = vst [vmem:[%s1637_s3 + $0x90] sm:$0xff] %v756_v53  ;;  %852 = vst [vmem:[%s1637_s3 + $0x190] sm:$0xff] %v788_v54 }
 0x13f   :  { %v400_v57 = vpop.f32.mrb[20].mxu0  ;;  %v496_v58 = vpop.f32.mrb[20].mxu1  ;;  %821 = vst [vmem:[%s1637_s3 + $0x98] sm:$0xff] %v757_v55  ;;  %853 = vst [vmem:[%s1637_s3 + $0x198] sm:$0xff] %v789_v56 }
 0x140   :  { %v402_v59 = vpop.f32.mrb[21].mxu0  ;;  %v498_v60 = vpop.f32.mrb[21].mxu1  ;;  %v758_v61 = vadd.f32 %v1374_v37, %v400_v57  ;;  %v790_v62 = vadd.f32 %v1374_v37, %v496_v58 }
 0x141   :  { %v759_v63 = vadd.f32 %v1376_v40, %v402_v59  ;;  %v791_v0 = vadd.f32 %v1376_v40, %v498_v60 }
 0x142   :  { %822 = vst [vmem:[%s1637_s3 + $0xa0] sm:$0xff] %v758_v61  ;;  %854 = vst [vmem:[%s1637_s3 + $0x1a0] sm:$0xff] %v790_v62 }
 0x143   :  { %v406_v1 = vpop.f32.mrb[22].mxu0  ;;  %v502_v2 = vpop.f32.mrb[22].mxu1  ;;  %823 = vst [vmem:[%s1637_s3 + $0xa8] sm:$0xff] %v759_v63  ;;  %855 = vst [vmem:[%s1637_s3 + $0x1a8] sm:$0xff] %v791_v0 }
 0x144   :  { %v408_v3 = vpop.f32.mrb[23].mxu0  ;;  %v504_v4 = vpop.f32.mrb[23].mxu1  ;;  %v760_v5 = vadd.f32 %v1374_v37, %v406_v1  ;;  %v792_v6 = vadd.f32 %v1374_v37, %v502_v2 }
 0x145   :  { %v761_v7 = vadd.f32 %v1376_v40, %v408_v3  ;;  %v793_v8 = vadd.f32 %v1376_v40, %v504_v4 }
 0x146   :  { %824 = vst [vmem:[%s1637_s3 + $0xb0] sm:$0xff] %v760_v5  ;;  %856 = vst [vmem:[%s1637_s3 + $0x1b0] sm:$0xff] %v792_v6 }
 0x147   :  { %v412_v9 = vpop.f32.mrb[24].mxu0  ;;  %v508_v10 = vpop.f32.mrb[24].mxu1  ;;  %825 = vst [vmem:[%s1637_s3 + $0xb8] sm:$0xff] %v761_v7  ;;  %857 = vst [vmem:[%s1637_s3 + $0x1b8] sm:$0xff] %v793_v8 }
 0x148   :  { %v414_v11 = vpop.f32.mrb[25].mxu0  ;;  %v510_v12 = vpop.f32.mrb[25].mxu1  ;;  %v762_v13 = vadd.f32 %v1374_v37, %v412_v9  ;;  %v794_v14 = vadd.f32 %v1374_v37, %v508_v10 }
 0x149   :  { %v763_v15 = vadd.f32 %v1376_v40, %v414_v11  ;;  %v795_v16 = vadd.f32 %v1376_v40, %v510_v12 }
 0x14a   :  { %826 = vst [vmem:[%s1637_s3 + $0xc0] sm:$0xff] %v762_v13  ;;  %858 = vst [vmem:[%s1637_s3 + $0x1c0] sm:$0xff] %v794_v14 }
 0x14b   :  { %v418_v17 = vpop.f32.mrb[26].mxu0  ;;  %v514_v18 = vpop.f32.mrb[26].mxu1  ;;  %827 = vst [vmem:[%s1637_s3 + $0xc8] sm:$0xff] %v763_v15  ;;  %859 = vst [vmem:[%s1637_s3 + $0x1c8] sm:$0xff] %v795_v16 }
 0x14c   :  { %v420_v19 = vpop.f32.mrb[27].mxu0  ;;  %v516_v20 = vpop.f32.mrb[27].mxu1  ;;  %v764_v21 = vadd.f32 %v1374_v37, %v418_v17  ;;  %v796_v22 = vadd.f32 %v1374_v37, %v514_v18 }
 0x14d   :  { %v765_v23 = vadd.f32 %v1376_v40, %v420_v19  ;;  %v797_v24 = vadd.f32 %v1376_v40, %v516_v20 }
 0x14e   :  { %828 = vst [vmem:[%s1637_s3 + $0xd0] sm:$0xff] %v764_v21  ;;  %860 = vst [vmem:[%s1637_s3 + $0x1d0] sm:$0xff] %v796_v22 }
 0x14f   :  { %v424_v25 = vpop.f32.mrb[28].mxu0  ;;  %v520_v26 = vpop.f32.mrb[28].mxu1  ;;  %829 = vst [vmem:[%s1637_s3 + $0xd8] sm:$0xff] %v765_v23  ;;  %861 = vst [vmem:[%s1637_s3 + $0x1d8] sm:$0xff] %v797_v24 }
 0x150   :  { %v426_v27 = vpop.f32.mrb[29].mxu0  ;;  %v522_v28 = vpop.f32.mrb[29].mxu1  ;;  %v766_v29 = vadd.f32 %v1374_v37, %v424_v25  ;;  %v798_v30 = vadd.f32 %v1374_v37, %v520_v26 }
 0x151   :  { %v767_v31 = vadd.f32 %v1376_v40, %v426_v27  ;;  %v799_v32 = vadd.f32 %v1376_v40, %v522_v28 }
 0x152   :  { %830 = vst [vmem:[%s1637_s3 + $0xe0] sm:$0xff] %v766_v29  ;;  %862 = vst [vmem:[%s1637_s3 + $0x1e0] sm:$0xff] %v798_v30 }
 0x153   :  { %v430_v33 = vpop.f32.mrb[30].mxu0  ;;  %v526_v34 = vpop.f32.mrb[30].mxu1  ;;  %831 = vst [vmem:[%s1637_s3 + $0xe8] sm:$0xff] %v767_v31  ;;  %863 = vst [vmem:[%s1637_s3 + $0x1e8] sm:$0xff] %v799_v32 }
 0x154   :  { %v432_v35 = vpop.f32.mrb[31].mxu0  ;;  %v528_v36 = vpop.f32.mrb[31].mxu1  ;;  %v768_v38 = vadd.f32 %v1374_v37, %v430_v33  ;;  %v800_v39 = vadd.f32 %v1374_v37, %v526_v34 }
 0x155   :  { %v769_v41 = vadd.f32 %v1376_v40, %v432_v35  ;;  %v801_v42 = vadd.f32 %v1376_v40, %v528_v36 }
 0x156   :  { %832 = vst [vmem:[%s1637_s3 + $0xf0] sm:$0xff] %v768_v38  ;;  %864 = vst [vmem:[%s1637_s3 + $0x1f0] sm:$0xff] %v800_v39 }
 0x157   :  { %833 = vst [vmem:[%s1637_s3 + $0xf8] sm:$0xff] %v769_v41  ;;  %865 = vst [vmem:[%s1637_s3 + $0x1f8] sm:$0xff] %v801_v42 }

</bundles_post_ra>
